<compile_context>
chip_gen: v5e
topology: v5e:2x2
jax: 0.10.0
libtpu: 0.0.40
codegen_flags: <defaults>
</compile_context>

<pallas_src>
import functools
import math

import jax
import jax.numpy as jnp
from jax import lax
from jax.experimental import pallas as pl
from jax.experimental.pallas import tpu as pltpu

_VMEM_LIMIT_BYTES = 32 * 1024 * 1024  # explicit; safe on v5e/v6e (128 MiB) and v7x (64 MiB)
_BN_EPS = 1e-5


# -----------------------------------------------------------------------------
# Fused C3 kernel (per batch element): cv1 -> bottleneck stack -> concat-fused
# cv3, plus cv2, all BN-folded, all in VMEM.
# TODO(synk): very large feature maps would need a spatially tiled grid with
# halo handling; here one grid step holds the full (C, H*W) map (tiny at spec
# shapes).
# -----------------------------------------------------------------------------
def _c3_kernel(*refs, n_bottlenecks, width):
    """refs = [x, tap_masks,
               cv1_w, cv1_b, cv2_w, cv2_b,
               (b1_w, b1_b, b2_w9, b2_b, b3_w, b3_b, down_w, down_b) * n,
               cv3_wA, cv3_wB, cv3_b,
               out]  (all weights/biases already BN-folded)"""
    x_ref, mask_ref = refs[0], refs[1]
    o_ref = refs[-1]
    w = refs[2:-1]

    hw = x_ref.shape[-1]
    x = x_ref[...].astype(jnp.float32)        # (c1, H*W)
    mask = mask_ref[...]                      # (9, H*W) float32 {0,1}

    def leaky(v, slope):
        return jnp.where(v >= 0.0, v, v * slope)

    def conv1x1(w_ref, b_ref, v):             # folded conv + BN (no activation)
        return jnp.dot(w_ref[...], v, preferred_element_type=jnp.float32) + b_ref[...]

    def conv3x3(w9_ref, b_ref, v):             # folded 3x3 conv (pad=1) + BN
        c_out = w9_ref.shape[1]
        acc = jnp.zeros((c_out, hw), jnp.float32)
        for t in range(9):
            dh, dw = divmod(t, 3)
            shift = (dh - 1) * width + (dw - 1)          # flattened tap offset
            if shift % hw == 0:
                tap = v
            else:
                tap = pltpu.roll(v, (-shift) % hw, axis=1)   # tap[p] = v[p+shift]
            acc = acc + jnp.dot(w9_ref[t], tap * mask[t:t + 1, :],
                                preferred_element_type=jnp.float32)
        return acc + b_ref[...]

    i = 0
    y1 = leaky(conv1x1(w[i], w[i + 1], x), 0.1); i += 2       # cv1 (+LeakyReLU 0.1)
    y2 = leaky(conv1x1(w[i], w[i + 1], x), 0.1); i += 2       # cv2 (+LeakyReLU 0.1)
    for _ in range(n_bottlenecks):
        h = leaky(conv1x1(w[i], w[i + 1], y1), 0.01)           # 1x1 + BN + LeakyReLU
        h = leaky(conv3x3(w[i + 2], w[i + 3], h), 0.01)        # 3x3 + BN + LeakyReLU
        # 1x1+BN, downsample(1x1+BN) on residual, add, LeakyReLU(0.01) -- fused.
        y1 = leaky(conv1x1(w[i + 4], w[i + 5], h)
                   + conv1x1(w[i + 6], w[i + 7], y1), 0.01)
        i += 8
    # cv3 over cat((y1, y2), dim=1) without materializing the concat:
    # W3 @ [y1; y2] == W3[:, :c_] @ y1 + W3[:, c_:] @ y2.
    out = (jnp.dot(w[i][...], y1, preferred_element_type=jnp.float32)
           + jnp.dot(w[i + 1][...], y2, preferred_element_type=jnp.float32)
           + w[i + 2][...])
    o_ref[...] = leaky(out, 0.1).astype(o_ref.dtype)


# -----------------------------------------------------------------------------
# BN folding (eval / serving running stats) directly into conv weights & bias.
# TODO(synk): training-mode BatchNorm (batch statistics) is not implemented.
# -----------------------------------------------------------------------------
def _fold_scale_bias(p, eps=_BN_EPS):
    scale = p["gamma"] / jnp.sqrt(p["var"] + eps)
    bias = p["beta"] - p["mean"] * scale
    if p["b"] is not None:
        bias = bias + p["b"] * scale
    return scale, bias


def _fold_1x1(p):
    scale, bias = _fold_scale_bias(p)
    return p["w"][:, :, 0, 0] * scale[:, None], bias.reshape(-1, 1)


def _fold_3x3(p):
    scale, bias = _fold_scale_bias(p)
    c_out, c_in = p["w"].shape[0], p["w"].shape[1]
    w9 = jnp.transpose(p["w"], (2, 3, 0, 1)).reshape(9, c_out, c_in)
    return w9 * scale[None, :, None], bias.reshape(-1, 1)


def _tap_masks(height, width):
    """(9, H*W) {0,1} masks: which output positions have a valid (zero-pad=invalid)
    input for each 3x3 tap in the flattened layout."""
    hh = jnp.arange(height).reshape(height, 1)
    ww = jnp.arange(width).reshape(1, width)
    rows = []
    for t in range(9):
        dh, dw = divmod(t, 3)
        valid = ((hh + dh - 1 >= 0) & (hh + dh - 1 < height) &
                 (ww + dw - 1 >= 0) & (ww + dw - 1 < width))
        rows.append(valid.reshape(height * width))
    return jnp.stack(rows).astype(jnp.float32)


def _const_spec(a):
    if a.ndim == 2:
        return pl.BlockSpec(a.shape, lambda b: (0, 0))
    return pl.BlockSpec(a.shape, lambda b: (0, 0, 0))


def c3_forward_pallas(x, params):
    """C3.forward: cv3(torch.cat((m(cv1(x)), cv2(x)), dim=1)), fully fused."""
    n, c1, height, width = x.shape
    hw = height * width
    c_ = params["cv1"]["w"].shape[0]
    c2 = params["cv3"]["w"].shape[0]
    xf = x.reshape(n, c1, hw)                         # lane-dense (N, C, H*W)

    inputs = [xf, _tap_masks(height, width)]
    in_specs = [pl.BlockSpec((None, c1, hw), lambda b: (b, 0, 0)),
                pl.BlockSpec((9, hw), lambda b: (0, 0))]

    def add(arr):
        inputs.append(arr)
        in_specs.append(_const_spec(arr))

    for name in ("cv1", "cv2"):
        w_, b_ = _fold_1x1(params[name]); add(w_); add(b_)
    for bp in params["m"]:
        w_, b_ = _fold_1x1(bp["conv1"]); add(w_); add(b_)
        w9, b2 = _fold_3x3(bp["conv2"]); add(w9); add(b2)
        w_, b_ = _fold_1x1(bp["conv3"]); add(w_); add(b_)
        w_, b_ = _fold_1x1(bp["down"]); add(w_); add(b_)
    w3, b3 = _fold_1x1(params["cv3"])
    add(w3[:, :c_]); add(w3[:, c_:]); add(b3)         # concat fused into cv3

    kernel = functools.partial(_c3_kernel, n_bottlenecks=len(params["m"]),
                               width=width)
    out = pl.pallas_call(
        kernel,
        out_shape=jax.ShapeDtypeStruct((n, c2, hw), x.dtype),
        grid=(n,),
        in_specs=in_specs,
        out_specs=pl.BlockSpec((None, c2, hw), lambda b: (b, 0, 0)),
        compiler_params=pltpu.CompilerParams(
            dimension_semantics=("parallel",),
            vmem_limit_bytes=_VMEM_LIMIT_BYTES),
    )(*inputs)
    return out.reshape(n, c2, height, width)


# -----------------------------------------------------------------------------
# Parameter init (mirrors the PyTorch module structure).
# -----------------------------------------------------------------------------
def _init_conv_bn(key, c_in, c_out, k, conv_bias):
    ks = jax.random.split(key, 6)
    w = jax.random.normal(ks[0], (c_out, c_in, k, k), jnp.float32)
    w = w / math.sqrt(c_in * k * k)
    return dict(
        w=w,
        b=(0.1 * jax.random.normal(ks[1], (c_out,), jnp.float32)
           if conv_bias else None),
        gamma=1.0 + 0.1 * jax.random.normal(ks[2], (c_out,), jnp.float32),
        beta=0.1 * jax.random.normal(ks[3], (c_out,), jnp.float32),
        mean=0.1 * jax.random.normal(ks[4], (c_out,), jnp.float32),
        var=0.5 + jax.random.uniform(ks[5], (c_out,), jnp.float32),
    )


def init_c3_params(key, c1, c2, n=1, e=0.5):
    c_ = int(c2 * e)
    keys = jax.random.split(key, 3 + n)
    # TODO(synk): the reference C3 builds Bottleneck(c_, c_, shortcut, g, e=1.0), which
    # raises TypeError with the provided ResNet-style Bottleneck (no `e` arg); we read
    # e=1.0 as expansion=1 (stride=shortcut->1, downsampling=g->True) so the stack keeps
    # c_ channels and cv3's 2*c_ input width stays valid.
    params = dict(
        cv1=_init_conv_bn(keys[0], c1, c_, 1, conv_bias=False),
        cv2=_init_conv_bn(keys[1], c1, c_, 1, conv_bias=False),
        cv3=_init_conv_bn(keys[2], 2 * c_, c2, 1, conv_bias=False),
        m=[],
    )
    for i in range(n):
        bk = jax.random.split(keys[3 + i], 4)
        params["m"].append(dict(
            conv1=_init_conv_bn(bk[0], c_, c_, 1, conv_bias=True),
            conv2=_init_conv_bn(bk[1], c_, c_, 3, conv_bias=True),
            conv3=_init_conv_bn(bk[2], c_, c_, 1, conv_bias=True),
            down=_init_conv_bn(bk[3], c_, c_, 1, conv_bias=True),
        ))
    return params


# -----------------------------------------------------------------------------
# Pure-JAX reference (mirrors the PyTorch graph, including the explicit concat).
# -----------------------------------------------------------------------------
def _ref_conv(x, w, b, padding):
    y = lax.conv_general_dilated(
        x, w, window_strides=(1, 1),
        padding=((padding, padding), (padding, padding)),
        dimension_numbers=("NCHW", "OIHW", "NCHW"),
        precision=lax.Precision.HIGHEST)
    if b is not None:
        y = y + b.reshape(1, -1, 1, 1)
    return y


def _ref_bn(x, p, eps=_BN_EPS):
    s = (1, -1, 1, 1)
    return ((x - p["mean"].reshape(s)) / jnp.sqrt(p["var"].reshape(s) + eps)
            * p["gamma"].reshape(s) + p["beta"].reshape(s))


def _ref_leaky(x, slope):
    return jnp.where(x >= 0, x, slope * x)


def _ref_block(x, p, padding, slope):
    y = _ref_bn(_ref_conv(x, p["w"], p["b"], padding), p)
    return _ref_leaky(y, slope) if slope is not None else y


def c3_forward_ref(x, params):
    y1 = _ref_block(x, params["cv1"], 0, 0.1)
    for bp in params["m"]:
        h = _ref_block(y1, bp["conv1"], 0, 0.01)
        h = _ref_block(h, bp["conv2"], 1, 0.01)
        h = _ref_block(h, bp["conv3"], 0, None)
        res = _ref_block(y1, bp["down"], 0, None)
        y1 = _ref_leaky(h + res, 0.01)
    y2 = _ref_block(x, params["cv2"], 0, 0.1)
    cat = jnp.concatenate([y1, y2], axis=1)          # torch.cat(..., dim=1)
    return _ref_block(cat, params["cv3"], 0, 0.1)


if __name__ == "__main__":
    key = jax.random.PRNGKey(0)
    k_x, k_p = jax.random.split(key)

    n_batch, c1, c2, height, width = 2, 8, 16, 16, 16
    x = jax.random.normal(k_x, (n_batch, c1, height, width), jnp.float32)
    params = init_c3_params(k_p, c1, c2, n=1, e=0.5)

    out = jax.jit(c3_forward_pallas)(x, params)
    out = jax.block_until_ready(out)

    ref = c3_forward_ref(x, params)
    assert out.shape == ref.shape == (n_batch, c2, height, width), (out.shape, ref.shape)
    max_err = float(jnp.max(jnp.abs(out - ref)))
    assert max_err < 5e-2, f"Pallas C3 mismatch vs reference: max abs err {max_err}"

    print("KERNEL_OK")
</pallas_src>

<mosaic_0001>
module attributes {stable_mosaic.version = 11 : i64} {
  func.func @_c3_kernel(%arg0: i32, %arg1: memref<1x8x256xf32, #tpu.memory_space<vmem>>, %arg2: memref<9x256xf32, #tpu.memory_space<vmem>>, %arg3: memref<8x8xf32, #tpu.memory_space<vmem>>, %arg4: memref<8x1xf32, #tpu.memory_space<vmem>>, %arg5: memref<8x8xf32, #tpu.memory_space<vmem>>, %arg6: memref<8x1xf32, #tpu.memory_space<vmem>>, %arg7: memref<8x8xf32, #tpu.memory_space<vmem>>, %arg8: memref<8x1xf32, #tpu.memory_space<vmem>>, %arg9: memref<9x8x8xf32, #tpu.memory_space<vmem>>, %arg10: memref<8x1xf32, #tpu.memory_space<vmem>>, %arg11: memref<8x8xf32, #tpu.memory_space<vmem>>, %arg12: memref<8x1xf32, #tpu.memory_space<vmem>>, %arg13: memref<8x8xf32, #tpu.memory_space<vmem>>, %arg14: memref<8x1xf32, #tpu.memory_space<vmem>>, %arg15: memref<16x8xf32, #tpu.memory_space<vmem>>, %arg16: memref<16x8xf32, #tpu.memory_space<vmem>>, %arg17: memref<16x1xf32, #tpu.memory_space<vmem>>, %arg18: memref<1x16x256xf32, #tpu.memory_space<vmem>>) attributes {dimension_semantics = [#tpu.dimension_semantics<parallel>], iteration_bounds = array<i64: 2>, scalar_prefetch = 0 : i64, scratch_operands = 0 : i64, tpu.core_type = #tpu.core_type<tc>, window_params = [{transform_indices = @transform_0, window_bounds = array<i64: 1, 8, 256>}, {pipeline_mode = #tpu.pipeline_mode<synchronous>, transform_indices = @transform_1, window_bounds = array<i64: 9, 256>}, {pipeline_mode = #tpu.pipeline_mode<synchronous>, transform_indices = @transform_2, window_bounds = array<i64: 8, 8>}, {pipeline_mode = #tpu.pipeline_mode<synchronous>, transform_indices = @transform_3, window_bounds = array<i64: 8, 1>}, {pipeline_mode = #tpu.pipeline_mode<synchronous>, transform_indices = @transform_4, window_bounds = array<i64: 8, 8>}, {pipeline_mode = #tpu.pipeline_mode<synchronous>, transform_indices = @transform_5, window_bounds = array<i64: 8, 1>}, {pipeline_mode = #tpu.pipeline_mode<synchronous>, transform_indices = @transform_6, window_bounds = array<i64: 8, 8>}, {pipeline_mode = #tpu.pipeline_mode<synchronous>, transform_indices = @transform_7, window_bounds = array<i64: 8, 1>}, {pipeline_mode = #tpu.pipeline_mode<synchronous>, transform_indices = @transform_8, window_bounds = array<i64: 9, 8, 8>}, {pipeline_mode = #tpu.pipeline_mode<synchronous>, transform_indices = @transform_9, window_bounds = array<i64: 8, 1>}, {pipeline_mode = #tpu.pipeline_mode<synchronous>, transform_indices = @transform_10, window_bounds = array<i64: 8, 8>}, {pipeline_mode = #tpu.pipeline_mode<synchronous>, transform_indices = @transform_11, window_bounds = array<i64: 8, 1>}, {pipeline_mode = #tpu.pipeline_mode<synchronous>, transform_indices = @transform_12, window_bounds = array<i64: 8, 8>}, {pipeline_mode = #tpu.pipeline_mode<synchronous>, transform_indices = @transform_13, window_bounds = array<i64: 8, 1>}, {pipeline_mode = #tpu.pipeline_mode<synchronous>, transform_indices = @transform_14, window_bounds = array<i64: 16, 8>}, {pipeline_mode = #tpu.pipeline_mode<synchronous>, transform_indices = @transform_15, window_bounds = array<i64: 16, 8>}, {pipeline_mode = #tpu.pipeline_mode<synchronous>, transform_indices = @transform_16, window_bounds = array<i64: 16, 1>}, {transform_indices = @transform_17, window_bounds = array<i64: 1, 16, 256>}]} {
    %c0 = arith.constant 0 : index
    %c0_0 = arith.constant 0 : index
    %c0_1 = arith.constant 0 : index
    %0 = vector.load %arg1[%c0, %c0_0, %c0_1] : memref<1x8x256xf32, #tpu.memory_space<vmem>>, vector<1x8x256xf32>
    %1 = vector.shape_cast %0 : vector<1x8x256xf32> to vector<8x256xf32>
    %c0_2 = arith.constant 0 : index
    %c0_3 = arith.constant 0 : index
    %2 = vector.load %arg2[%c0_2, %c0_3] : memref<9x256xf32, #tpu.memory_space<vmem>>, vector<9x256xf32>
    %c0_4 = arith.constant 0 : index
    %c0_5 = arith.constant 0 : index
    %3 = vector.load %arg3[%c0_4, %c0_5] : memref<8x8xf32, #tpu.memory_space<vmem>>, vector<8x8xf32>
    %cst = arith.constant dense<0.000000e+00> : vector<8x256xf32>
    %4 = tpu.matmul %3, %1, %cst {dimension_numbers = #tpu.dot_dimension_numbers<[1], [0], [0], [1], [0, 0, 1, 1], [], []>} : vector<8x8xf32>, vector<8x256xf32>, vector<8x256xf32> -> vector<8x256xf32>
    %c0_6 = arith.constant 0 : index
    %c0_7 = arith.constant 0 : index
    %5 = vector.load %arg4[%c0_6, %c0_7] : memref<8x1xf32, #tpu.memory_space<vmem>>, vector<8x1xf32>
    %6 = vector.broadcast %5 : vector<8x1xf32> to vector<8x256xf32>
    %7 = arith.addf %4, %6 : vector<8x256xf32>
    %cst_8 = arith.constant 0.000000e+00 : f32
    %8 = vector.broadcast %cst_8 : f32 to vector<8x256xf32>
    %9 = arith.cmpf oge, %7, %8 : vector<8x256xf32>
    %cst_9 = arith.constant 1.000000e-01 : f32
    %10 = vector.broadcast %cst_9 : f32 to vector<8x256xf32>
    %11 = arith.mulf %7, %10 : vector<8x256xf32>
    %12 = arith.select %9, %7, %11 : vector<8x256xi1>, vector<8x256xf32>
    %c0_10 = arith.constant 0 : index
    %c0_11 = arith.constant 0 : index
    %13 = vector.load %arg5[%c0_10, %c0_11] : memref<8x8xf32, #tpu.memory_space<vmem>>, vector<8x8xf32>
    %cst_12 = arith.constant dense<0.000000e+00> : vector<8x256xf32>
    %14 = tpu.matmul %13, %1, %cst_12 {dimension_numbers = #tpu.dot_dimension_numbers<[1], [0], [0], [1], [0, 0, 1, 1], [], []>} : vector<8x8xf32>, vector<8x256xf32>, vector<8x256xf32> -> vector<8x256xf32>
    %c0_13 = arith.constant 0 : index
    %c0_14 = arith.constant 0 : index
    %15 = vector.load %arg6[%c0_13, %c0_14] : memref<8x1xf32, #tpu.memory_space<vmem>>, vector<8x1xf32>
    %16 = vector.broadcast %15 : vector<8x1xf32> to vector<8x256xf32>
    %17 = arith.addf %14, %16 : vector<8x256xf32>
    %cst_15 = arith.constant 0.000000e+00 : f32
    %18 = vector.broadcast %cst_15 : f32 to vector<8x256xf32>
    %19 = arith.cmpf oge, %17, %18 : vector<8x256xf32>
    %cst_16 = arith.constant 1.000000e-01 : f32
    %20 = vector.broadcast %cst_16 : f32 to vector<8x256xf32>
    %21 = arith.mulf %17, %20 : vector<8x256xf32>
    %22 = arith.select %19, %17, %21 : vector<8x256xi1>, vector<8x256xf32>
    %c0_17 = arith.constant 0 : index
    %c0_18 = arith.constant 0 : index
    %23 = vector.load %arg7[%c0_17, %c0_18] : memref<8x8xf32, #tpu.memory_space<vmem>>, vector<8x8xf32>
    %cst_19 = arith.constant dense<0.000000e+00> : vector<8x256xf32>
    %24 = tpu.matmul %23, %12, %cst_19 {dimension_numbers = #tpu.dot_dimension_numbers<[1], [0], [0], [1], [0, 0, 1, 1], [], []>} : vector<8x8xf32>, vector<8x256xf32>, vector<8x256xf32> -> vector<8x256xf32>
    %c0_20 = arith.constant 0 : index
    %c0_21 = arith.constant 0 : index
    %25 = vector.load %arg8[%c0_20, %c0_21] : memref<8x1xf32, #tpu.memory_space<vmem>>, vector<8x1xf32>
    %26 = vector.broadcast %25 : vector<8x1xf32> to vector<8x256xf32>
    %27 = arith.addf %24, %26 : vector<8x256xf32>
    %cst_22 = arith.constant 0.000000e+00 : f32
    %28 = vector.broadcast %cst_22 : f32 to vector<8x256xf32>
    %29 = arith.cmpf oge, %27, %28 : vector<8x256xf32>
    %cst_23 = arith.constant 0.00999999977 : f32
    %30 = vector.broadcast %cst_23 : f32 to vector<8x256xf32>
    %31 = arith.mulf %27, %30 : vector<8x256xf32>
    %32 = arith.select %29, %27, %31 : vector<8x256xi1>, vector<8x256xf32>
    %cst_24 = arith.constant 0.000000e+00 : f32
    %33 = vector.broadcast %cst_24 : f32 to vector<8x256xf32>
    %c17_i32 = arith.constant 17 : i32
    %34 = tpu.dynamic_rotate %32 by %c17_i32 dim 1 : vector<8x256xf32>, i32 -> vector<8x256xf32>
    %c0_25 = arith.constant 0 : index
    %c0_26 = arith.constant 0 : index
    %c0_27 = arith.constant 0 : index
    %35 = vector.load %arg9[%c0_25, %c0_26, %c0_27] : memref<9x8x8xf32, #tpu.memory_space<vmem>>, vector<1x8x8xf32>
    %36 = vector.shape_cast %35 : vector<1x8x8xf32> to vector<8x8xf32>
    %37 = vector.extract_strided_slice %2 {offsets = [0, 0], sizes = [1, 256], strides = [1, 1]} : vector<9x256xf32> to vector<1x256xf32>
    %38 = vector.broadcast %37 : vector<1x256xf32> to vector<8x256xf32>
    %39 = arith.mulf %34, %38 : vector<8x256xf32>
    %cst_28 = arith.constant dense<0.000000e+00> : vector<8x256xf32>
    %40 = tpu.matmul %36, %39, %cst_28 {dimension_numbers = #tpu.dot_dimension_numbers<[1], [0], [0], [1], [0, 0, 1, 1], [], []>} : vector<8x8xf32>, vector<8x256xf32>, vector<8x256xf32> -> vector<8x256xf32>
    %41 = arith.addf %33, %40 : vector<8x256xf32>
    %c16_i32 = arith.constant 16 : i32
    %42 = tpu.dynamic_rotate %32 by %c16_i32 dim 1 : vector<8x256xf32>, i32 -> vector<8x256xf32>
    %c1 = arith.constant 1 : index
    %c0_29 = arith.constant 0 : index
    %c0_30 = arith.constant 0 : index
    %43 = vector.load %arg9[%c1, %c0_29, %c0_30] : memref<9x8x8xf32, #tpu.memory_space<vmem>>, vector<1x8x8xf32>
    %44 = vector.shape_cast %43 : vector<1x8x8xf32> to vector<8x8xf32>
    %45 = vector.extract_strided_slice %2 {offsets = [1, 0], sizes = [1, 256], strides = [1, 1]} : vector<9x256xf32> to vector<1x256xf32>
    %46 = vector.broadcast %45 : vector<1x256xf32> to vector<8x256xf32>
    %47 = arith.mulf %42, %46 : vector<8x256xf32>
    %cst_31 = arith.constant dense<0.000000e+00> : vector<8x256xf32>
    %48 = tpu.matmul %44, %47, %cst_31 {dimension_numbers = #tpu.dot_dimension_numbers<[1], [0], [0], [1], [0, 0, 1, 1], [], []>} : vector<8x8xf32>, vector<8x256xf32>, vector<8x256xf32> -> vector<8x256xf32>
    %49 = arith.addf %41, %48 : vector<8x256xf32>
    %c15_i32 = arith.constant 15 : i32
    %50 = tpu.dynamic_rotate %32 by %c15_i32 dim 1 : vector<8x256xf32>, i32 -> vector<8x256xf32>
    %c2 = arith.constant 2 : index
    %c0_32 = arith.constant 0 : index
    %c0_33 = arith.constant 0 : index
    %51 = vector.load %arg9[%c2, %c0_32, %c0_33] : memref<9x8x8xf32, #tpu.memory_space<vmem>>, vector<1x8x8xf32>
    %52 = vector.shape_cast %51 : vector<1x8x8xf32> to vector<8x8xf32>
    %53 = vector.extract_strided_slice %2 {offsets = [2, 0], sizes = [1, 256], strides = [1, 1]} : vector<9x256xf32> to vector<1x256xf32>
    %54 = vector.broadcast %53 : vector<1x256xf32> to vector<8x256xf32>
    %55 = arith.mulf %50, %54 : vector<8x256xf32>
    %cst_34 = arith.constant dense<0.000000e+00> : vector<8x256xf32>
    %56 = tpu.matmul %52, %55, %cst_34 {dimension_numbers = #tpu.dot_dimension_numbers<[1], [0], [0], [1], [0, 0, 1, 1], [], []>} : vector<8x8xf32>, vector<8x256xf32>, vector<8x256xf32> -> vector<8x256xf32>
    %57 = arith.addf %49, %56 : vector<8x256xf32>
    %c1_i32 = arith.constant 1 : i32
    %58 = tpu.dynamic_rotate %32 by %c1_i32 dim 1 : vector<8x256xf32>, i32 -> vector<8x256xf32>
    %c3 = arith.constant 3 : index
    %c0_35 = arith.constant 0 : index
    %c0_36 = arith.constant 0 : index
    %59 = vector.load %arg9[%c3, %c0_35, %c0_36] : memref<9x8x8xf32, #tpu.memory_space<vmem>>, vector<1x8x8xf32>
    %60 = vector.shape_cast %59 : vector<1x8x8xf32> to vector<8x8xf32>
    %61 = vector.extract_strided_slice %2 {offsets = [3, 0], sizes = [1, 256], strides = [1, 1]} : vector<9x256xf32> to vector<1x256xf32>
    %62 = vector.broadcast %61 : vector<1x256xf32> to vector<8x256xf32>
    %63 = arith.mulf %58, %62 : vector<8x256xf32>
    %cst_37 = arith.constant dense<0.000000e+00> : vector<8x256xf32>
    %64 = tpu.matmul %60, %63, %cst_37 {dimension_numbers = #tpu.dot_dimension_numbers<[1], [0], [0], [1], [0, 0, 1, 1], [], []>} : vector<8x8xf32>, vector<8x256xf32>, vector<8x256xf32> -> vector<8x256xf32>
    %65 = arith.addf %57, %64 : vector<8x256xf32>
    %c4 = arith.constant 4 : index
    %c0_38 = arith.constant 0 : index
    %c0_39 = arith.constant 0 : index
    %66 = vector.load %arg9[%c4, %c0_38, %c0_39] : memref<9x8x8xf32, #tpu.memory_space<vmem>>, vector<1x8x8xf32>
    %67 = vector.shape_cast %66 : vector<1x8x8xf32> to vector<8x8xf32>
    %68 = vector.extract_strided_slice %2 {offsets = [4, 0], sizes = [1, 256], strides = [1, 1]} : vector<9x256xf32> to vector<1x256xf32>
    %69 = vector.broadcast %68 : vector<1x256xf32> to vector<8x256xf32>
    %70 = arith.mulf %32, %69 : vector<8x256xf32>
    %cst_40 = arith.constant dense<0.000000e+00> : vector<8x256xf32>
    %71 = tpu.matmul %67, %70, %cst_40 {dimension_numbers = #tpu.dot_dimension_numbers<[1], [0], [0], [1], [0, 0, 1, 1], [], []>} : vector<8x8xf32>, vector<8x256xf32>, vector<8x256xf32> -> vector<8x256xf32>
    %72 = arith.addf %65, %71 : vector<8x256xf32>
    %c255_i32 = arith.constant 255 : i32
    %73 = tpu.dynamic_rotate %32 by %c255_i32 dim 1 : vector<8x256xf32>, i32 -> vector<8x256xf32>
    %c5 = arith.constant 5 : index
    %c0_41 = arith.constant 0 : index
    %c0_42 = arith.constant 0 : index
    %74 = vector.load %arg9[%c5, %c0_41, %c0_42] : memref<9x8x8xf32, #tpu.memory_space<vmem>>, vector<1x8x8xf32>
    %75 = vector.shape_cast %74 : vector<1x8x8xf32> to vector<8x8xf32>
    %76 = vector.extract_strided_slice %2 {offsets = [5, 0], sizes = [1, 256], strides = [1, 1]} : vector<9x256xf32> to vector<1x256xf32>
    %77 = vector.broadcast %76 : vector<1x256xf32> to vector<8x256xf32>
    %78 = arith.mulf %73, %77 : vector<8x256xf32>
    %cst_43 = arith.constant dense<0.000000e+00> : vector<8x256xf32>
    %79 = tpu.matmul %75, %78, %cst_43 {dimension_numbers = #tpu.dot_dimension_numbers<[1], [0], [0], [1], [0, 0, 1, 1], [], []>} : vector<8x8xf32>, vector<8x256xf32>, vector<8x256xf32> -> vector<8x256xf32>
    %80 = arith.addf %72, %79 : vector<8x256xf32>
    %c241_i32 = arith.constant 241 : i32
    %81 = tpu.dynamic_rotate %32 by %c241_i32 dim 1 : vector<8x256xf32>, i32 -> vector<8x256xf32>
    %c6 = arith.constant 6 : index
    %c0_44 = arith.constant 0 : index
    %c0_45 = arith.constant 0 : index
    %82 = vector.load %arg9[%c6, %c0_44, %c0_45] : memref<9x8x8xf32, #tpu.memory_space<vmem>>, vector<1x8x8xf32>
    %83 = vector.shape_cast %82 : vector<1x8x8xf32> to vector<8x8xf32>
    %84 = vector.extract_strided_slice %2 {offsets = [6, 0], sizes = [1, 256], strides = [1, 1]} : vector<9x256xf32> to vector<1x256xf32>
    %85 = vector.broadcast %84 : vector<1x256xf32> to vector<8x256xf32>
    %86 = arith.mulf %81, %85 : vector<8x256xf32>
    %cst_46 = arith.constant dense<0.000000e+00> : vector<8x256xf32>
    %87 = tpu.matmul %83, %86, %cst_46 {dimension_numbers = #tpu.dot_dimension_numbers<[1], [0], [0], [1], [0, 0, 1, 1], [], []>} : vector<8x8xf32>, vector<8x256xf32>, vector<8x256xf32> -> vector<8x256xf32>
    %88 = arith.addf %80, %87 : vector<8x256xf32>
    %c240_i32 = arith.constant 240 : i32
    %89 = tpu.dynamic_rotate %32 by %c240_i32 dim 1 : vector<8x256xf32>, i32 -> vector<8x256xf32>
    %c7 = arith.constant 7 : index
    %c0_47 = arith.constant 0 : index
    %c0_48 = arith.constant 0 : index
    %90 = vector.load %arg9[%c7, %c0_47, %c0_48] : memref<9x8x8xf32, #tpu.memory_space<vmem>>, vector<1x8x8xf32>
    %91 = vector.shape_cast %90 : vector<1x8x8xf32> to vector<8x8xf32>
    %92 = vector.extract_strided_slice %2 {offsets = [7, 0], sizes = [1, 256], strides = [1, 1]} : vector<9x256xf32> to vector<1x256xf32>
    %93 = vector.broadcast %92 : vector<1x256xf32> to vector<8x256xf32>
    %94 = arith.mulf %89, %93 : vector<8x256xf32>
    %cst_49 = arith.constant dense<0.000000e+00> : vector<8x256xf32>
    %95 = tpu.matmul %91, %94, %cst_49 {dimension_numbers = #tpu.dot_dimension_numbers<[1], [0], [0], [1], [0, 0, 1, 1], [], []>} : vector<8x8xf32>, vector<8x256xf32>, vector<8x256xf32> -> vector<8x256xf32>
    %96 = arith.addf %88, %95 : vector<8x256xf32>
    %c239_i32 = arith.constant 239 : i32
    %97 = tpu.dynamic_rotate %32 by %c239_i32 dim 1 : vector<8x256xf32>, i32 -> vector<8x256xf32>
    %c8 = arith.constant 8 : index
    %c0_50 = arith.constant 0 : index
    %c0_51 = arith.constant 0 : index
    %98 = vector.load %arg9[%c8, %c0_50, %c0_51] : memref<9x8x8xf32, #tpu.memory_space<vmem>>, vector<1x8x8xf32>
    %99 = vector.shape_cast %98 : vector<1x8x8xf32> to vector<8x8xf32>
    %100 = vector.extract_strided_slice %2 {offsets = [8, 0], sizes = [1, 256], strides = [1, 1]} : vector<9x256xf32> to vector<1x256xf32>
    %101 = vector.broadcast %100 : vector<1x256xf32> to vector<8x256xf32>
    %102 = arith.mulf %97, %101 : vector<8x256xf32>
    %cst_52 = arith.constant dense<0.000000e+00> : vector<8x256xf32>
    %103 = tpu.matmul %99, %102, %cst_52 {dimension_numbers = #tpu.dot_dimension_numbers<[1], [0], [0], [1], [0, 0, 1, 1], [], []>} : vector<8x8xf32>, vector<8x256xf32>, vector<8x256xf32> -> vector<8x256xf32>
    %104 = arith.addf %96, %103 : vector<8x256xf32>
    %c0_53 = arith.constant 0 : index
    %c0_54 = arith.constant 0 : index
    %105 = vector.load %arg10[%c0_53, %c0_54] : memref<8x1xf32, #tpu.memory_space<vmem>>, vector<8x1xf32>
    %106 = vector.broadcast %105 : vector<8x1xf32> to vector<8x256xf32>
    %107 = arith.addf %104, %106 : vector<8x256xf32>
    %cst_55 = arith.constant 0.000000e+00 : f32
    %108 = vector.broadcast %cst_55 : f32 to vector<8x256xf32>
    %109 = arith.cmpf oge, %107, %108 : vector<8x256xf32>
    %cst_56 = arith.constant 0.00999999977 : f32
    %110 = vector.broadcast %cst_56 : f32 to vector<8x256xf32>
    %111 = arith.mulf %107, %110 : vector<8x256xf32>
    %112 = arith.select %109, %107, %111 : vector<8x256xi1>, vector<8x256xf32>
    %c0_57 = arith.constant 0 : index
    %c0_58 = arith.constant 0 : index
    %113 = vector.load %arg11[%c0_57, %c0_58] : memref<8x8xf32, #tpu.memory_space<vmem>>, vector<8x8xf32>
    %cst_59 = arith.constant dense<0.000000e+00> : vector<8x256xf32>
    %114 = tpu.matmul %113, %112, %cst_59 {dimension_numbers = #tpu.dot_dimension_numbers<[1], [0], [0], [1], [0, 0, 1, 1], [], []>} : vector<8x8xf32>, vector<8x256xf32>, vector<8x256xf32> -> vector<8x256xf32>
    %c0_60 = arith.constant 0 : index
    %c0_61 = arith.constant 0 : index
    %115 = vector.load %arg12[%c0_60, %c0_61] : memref<8x1xf32, #tpu.memory_space<vmem>>, vector<8x1xf32>
    %116 = vector.broadcast %115 : vector<8x1xf32> to vector<8x256xf32>
    %117 = arith.addf %114, %116 : vector<8x256xf32>
    %c0_62 = arith.constant 0 : index
    %c0_63 = arith.constant 0 : index
    %118 = vector.load %arg13[%c0_62, %c0_63] : memref<8x8xf32, #tpu.memory_space<vmem>>, vector<8x8xf32>
    %cst_64 = arith.constant dense<0.000000e+00> : vector<8x256xf32>
    %119 = tpu.matmul %118, %12, %cst_64 {dimension_numbers = #tpu.dot_dimension_numbers<[1], [0], [0], [1], [0, 0, 1, 1], [], []>} : vector<8x8xf32>, vector<8x256xf32>, vector<8x256xf32> -> vector<8x256xf32>
    %c0_65 = arith.constant 0 : index
    %c0_66 = arith.constant 0 : index
    %120 = vector.load %arg14[%c0_65, %c0_66] : memref<8x1xf32, #tpu.memory_space<vmem>>, vector<8x1xf32>
    %121 = vector.broadcast %120 : vector<8x1xf32> to vector<8x256xf32>
    %122 = arith.addf %119, %121 : vector<8x256xf32>
    %123 = arith.addf %117, %122 : vector<8x256xf32>
    %cst_67 = arith.constant 0.000000e+00 : f32
    %124 = vector.broadcast %cst_67 : f32 to vector<8x256xf32>
    %125 = arith.cmpf oge, %123, %124 : vector<8x256xf32>
    %cst_68 = arith.constant 0.00999999977 : f32
    %126 = vector.broadcast %cst_68 : f32 to vector<8x256xf32>
    %127 = arith.mulf %123, %126 : vector<8x256xf32>
    %128 = arith.select %125, %123, %127 : vector<8x256xi1>, vector<8x256xf32>
    %c0_69 = arith.constant 0 : index
    %c0_70 = arith.constant 0 : index
    %129 = vector.load %arg15[%c0_69, %c0_70] : memref<16x8xf32, #tpu.memory_space<vmem>>, vector<16x8xf32>
    %cst_71 = arith.constant dense<0.000000e+00> : vector<16x256xf32>
    %130 = tpu.matmul %129, %128, %cst_71 {dimension_numbers = #tpu.dot_dimension_numbers<[1], [0], [0], [1], [0, 0, 1, 1], [], []>} : vector<16x8xf32>, vector<8x256xf32>, vector<16x256xf32> -> vector<16x256xf32>
    %c0_72 = arith.constant 0 : index
    %c0_73 = arith.constant 0 : index
    %131 = vector.load %arg16[%c0_72, %c0_73] : memref<16x8xf32, #tpu.memory_space<vmem>>, vector<16x8xf32>
    %cst_74 = arith.constant dense<0.000000e+00> : vector<16x256xf32>
    %132 = tpu.matmul %131, %22, %cst_74 {dimension_numbers = #tpu.dot_dimension_numbers<[1], [0], [0], [1], [0, 0, 1, 1], [], []>} : vector<16x8xf32>, vector<8x256xf32>, vector<16x256xf32> -> vector<16x256xf32>
    %133 = arith.addf %130, %132 : vector<16x256xf32>
    %c0_75 = arith.constant 0 : index
    %c0_76 = arith.constant 0 : index
    %134 = vector.load %arg17[%c0_75, %c0_76] : memref<16x1xf32, #tpu.memory_space<vmem>>, vector<16x1xf32>
    %135 = vector.broadcast %134 : vector<16x1xf32> to vector<16x256xf32>
    %136 = arith.addf %133, %135 : vector<16x256xf32>
    %cst_77 = arith.constant 0.000000e+00 : f32
    %137 = vector.broadcast %cst_77 : f32 to vector<16x256xf32>
    %138 = arith.cmpf oge, %136, %137 : vector<16x256xf32>
    %cst_78 = arith.constant 1.000000e-01 : f32
    %139 = vector.broadcast %cst_78 : f32 to vector<16x256xf32>
    %140 = arith.mulf %136, %139 : vector<16x256xf32>
    %141 = arith.select %138, %136, %140 : vector<16x256xi1>, vector<16x256xf32>
    %c0_79 = arith.constant 0 : index
    %c0_80 = arith.constant 0 : index
    %c0_81 = arith.constant 0 : index
    %142 = vector.load %arg18[%c0_79, %c0_80, %c0_81] : memref<1x16x256xf32, #tpu.memory_space<vmem>>, vector<1x16x256xf32>
    %143 = vector.shape_cast %142 : vector<1x16x256xf32> to vector<16x256xf32>
    %144 = vector.shape_cast %141 : vector<16x256xf32> to vector<1x16x256xf32>
    tpu.vector_store %arg18[%c0_79, %c0_80, %c0_81], %144 {strides = array<i32>} : memref<1x16x256xf32, #tpu.memory_space<vmem>>, vector<1x16x256xf32>,
    return
  }
  func.func @transform_0(%arg0: i32) -> (i32, i32, i32) {
    %c0_i32 = arith.constant 0 : i32
    %c0_i32_0 = arith.constant 0 : i32
    %c0_i32_1 = arith.constant 0 : i32
    return %arg0, %c0_i32, %c0_i32_0 : i32, i32, i32
  }
  func.func @transform_1(%arg0: i32) -> (i32, i32) {
    %c0_i32 = arith.constant 0 : i32
    %c0_i32_0 = arith.constant 0 : i32
    %c0_i32_1 = arith.constant 0 : i32
    return %c0_i32, %c0_i32_0 : i32, i32
  }
  func.func @transform_2(%arg0: i32) -> (i32, i32) {
    %c0_i32 = arith.constant 0 : i32
    %c0_i32_0 = arith.constant 0 : i32
    %c0_i32_1 = arith.constant 0 : i32
    return %c0_i32, %c0_i32_0 : i32, i32
  }
  func.func @transform_3(%arg0: i32) -> (i32, i32) {
    %c0_i32 = arith.constant 0 : i32
    %c0_i32_0 = arith.constant 0 : i32
    %c0_i32_1 = arith.constant 0 : i32
    return %c0_i32, %c0_i32_0 : i32, i32
  }
  func.func @transform_4(%arg0: i32) -> (i32, i32) {
    %c0_i32 = arith.constant 0 : i32
    %c0_i32_0 = arith.constant 0 : i32
    %c0_i32_1 = arith.constant 0 : i32
    return %c0_i32, %c0_i32_0 : i32, i32
  }
  func.func @transform_5(%arg0: i32) -> (i32, i32) {
    %c0_i32 = arith.constant 0 : i32
    %c0_i32_0 = arith.constant 0 : i32
    %c0_i32_1 = arith.constant 0 : i32
    return %c0_i32, %c0_i32_0 : i32, i32
  }
  func.func @transform_6(%arg0: i32) -> (i32, i32) {
    %c0_i32 = arith.constant 0 : i32
    %c0_i32_0 = arith.constant 0 : i32
    %c0_i32_1 = arith.constant 0 : i32
    return %c0_i32, %c0_i32_0 : i32, i32
  }
  func.func @transform_7(%arg0: i32) -> (i32, i32) {
    %c0_i32 = arith.constant 0 : i32
    %c0_i32_0 = arith.constant 0 : i32
    %c0_i32_1 = arith.constant 0 : i32
    return %c0_i32, %c0_i32_0 : i32, i32
  }
  func.func @transform_8(%arg0: i32) -> (i32, i32, i32) {
    %c0_i32 = arith.constant 0 : i32
    %c0_i32_0 = arith.constant 0 : i32
    %c0_i32_1 = arith.constant 0 : i32
    %c0_i32_2 = arith.constant 0 : i32
    return %c0_i32, %c0_i32_0, %c0_i32_1 : i32, i32, i32
  }
  func.func @transform_9(%arg0: i32) -> (i32, i32) {
    %c0_i32 = arith.constant 0 : i32
    %c0_i32_0 = arith.constant 0 : i32
    %c0_i32_1 = arith.constant 0 : i32
    return %c0_i32, %c0_i32_0 : i32, i32
  }
  func.func @transform_10(%arg0: i32) -> (i32, i32) {
    %c0_i32 = arith.constant 0 : i32
    %c0_i32_0 = arith.constant 0 : i32
    %c0_i32_1 = arith.constant 0 : i32
    return %c0_i32, %c0_i32_0 : i32, i32
  }
  func.func @transform_11(%arg0: i32) -> (i32, i32) {
    %c0_i32 = arith.constant 0 : i32
    %c0_i32_0 = arith.constant 0 : i32
    %c0_i32_1 = arith.constant 0 : i32
    return %c0_i32, %c0_i32_0 : i32, i32
  }
  func.func @transform_12(%arg0: i32) -> (i32, i32) {
    %c0_i32 = arith.constant 0 : i32
    %c0_i32_0 = arith.constant 0 : i32
    %c0_i32_1 = arith.constant 0 : i32
    return %c0_i32, %c0_i32_0 : i32, i32
  }
  func.func @transform_13(%arg0: i32) -> (i32, i32) {
    %c0_i32 = arith.constant 0 : i32
    %c0_i32_0 = arith.constant 0 : i32
    %c0_i32_1 = arith.constant 0 : i32
    return %c0_i32, %c0_i32_0 : i32, i32
  }
  func.func @transform_14(%arg0: i32) -> (i32, i32) {
    %c0_i32 = arith.constant 0 : i32
    %c0_i32_0 = arith.constant 0 : i32
    %c0_i32_1 = arith.constant 0 : i32
    return %c0_i32, %c0_i32_0 : i32, i32
  }
  func.func @transform_15(%arg0: i32) -> (i32, i32) {
    %c0_i32 = arith.constant 0 : i32
    %c0_i32_0 = arith.constant 0 : i32
    %c0_i32_1 = arith.constant 0 : i32
    return %c0_i32, %c0_i32_0 : i32, i32
  }
  func.func @transform_16(%arg0: i32) -> (i32, i32) {
    %c0_i32 = arith.constant 0 : i32
    %c0_i32_0 = arith.constant 0 : i32
    %c0_i32_1 = arith.constant 0 : i32
    return %c0_i32, %c0_i32_0 : i32, i32
  }
  func.func @transform_17(%arg0: i32) -> (i32, i32, i32) {
    %c0_i32 = arith.constant 0 : i32
    %c0_i32_0 = arith.constant 0 : i32
    %c0_i32_1 = arith.constant 0 : i32
    return %arg0, %c0_i32, %c0_i32_0 : i32, i32, i32
  }
}

</mosaic_0001>

<bundles_post_ra>
// kernel: c3_forward_pallas.1
= control target key start
LH: loop header
LB: loop body
LE: loop exit
PB: predicated region body
PF: predicated region fallthrough
CT: control target
= control target key end

     0   :  { %s1739_s24 = smov 0   ;;  %s1935_s0 = inlined_call_operand.vmem [shape: f32[2,8,256], index: 0, kind: input, shape index: {}]   ;;  %s1936_s1 = inlined_call_operand.vmem [shape: f32[9,256], index: 1, kind: input, shape index: {}]   ;;  %s1937_s2 = inlined_call_operand.vmem [shape: f32[8,8], index: 2, kind: input, shape index: {}]   ;;  %s1938_s3 = inlined_call_operand.vmem [shape: f32[8,1], index: 3, kind: input, shape index: {}]   ;;  %s1939_s4 = inlined_call_operand.vmem [shape: f32[8,8], index: 4, kind: input, shape index: {}]   ;;  %s1940_s5 = inlined_call_operand.vmem [shape: f32[8,1], index: 5, kind: input, shape index: {}]   ;;  %s1941_s6 = inlined_call_operand.vmem [shape: f32[8,8], index: 6, kind: input, shape index: {}]   ;;  %s1942_s7 = inlined_call_operand.vmem [shape: f32[8,1], index: 7, kind: input, shape index: {}]   ;;  %s1943_s8 = inlined_call_operand.vmem [shape: f32[9,8,8], index: 8, kind: input, shape index: {}]   ;;  %s1944_s9 = inlined_call_operand.vmem [shape: f32[8,1], index: 9, kind: input, shape index: {}]   ;;  %s1945_s10 = inlined_call_operand.vmem [shape: f32[8,8], index: 10, kind: input, shape index: {}]   ;;  %s1946_s11 = inlined_call_operand.vmem [shape: f32[8,1], index: 11, kind: input, shape index: {}]   ;;  %s1947_s12 = inlined_call_operand.vmem [shape: f32[8,8], index: 12, kind: input, shape index: {}]   ;;  %s1948_s13 = inlined_call_operand.vmem [shape: f32[8,1], index: 13, kind: input, shape index: {}]   ;;  %s1949_s14 = inlined_call_operand.vmem [shape: f32[16,8], index: 14, kind: input, shape index: {}]   ;;  %s1950_s15 = inlined_call_operand.vmem [shape: f32[16,8], index: 15, kind: input, shape index: {}]   ;;  %s1951_s16 = inlined_call_operand.vmem [shape: f32[16,1], index: 16, kind: input, shape index: {}]   ;;  %s1952_s17 = inlined_call_operand.vmem [shape: f32[2,16,256], index: 17, kind: output, shape index: {}]  }
   0x1   :  { %1954 = sst [smem:[#allocation2_spill]] %s1935_s0 }
   0x2   :  { %1955 = sst [smem:[#allocation3_spill]] %s1936_s1 }
   0x3 LB: > { %s1553_s25 = sadd.s32 4294967295, %s1638_s24   ;;  %p1557_p0 = scmp.ge.s32.totalorder %s1638_s24, 1  ;;  %s1638_s24 = sphi %s1739_s24, %s27_s24  }
   0x4   : > { %p487_p1 = scmp.lt.s32.totalorder %s1638_s24, 3 }
   0x6   : > { %p488_p2 = pnand %p1557_p0, %p487_p1 }
   0x7   : > { %p539_p3 = scmp.lt.s32.totalorder (!%p488_p2), %s1553_s25, 1  ;;  %s1956_s30 = sld [smem:[#allocation2_spill]] (!%p488_p2) }
   0x8   : > { %491 = sbr.rel (%p488_p2) target bundleno = 865 (0x361), region = 88  ;;  %s1642_s29 = smov (!%p488_p2), 15  }
   0x9   : > { %s1643_s0 = smov (!%p488_p2), 16   ;;  %s1646_s19 = smov (!%p488_p2), 111  }
   0xa   : > { %s1647_s1 = smov (!%p488_p2), 113   ;;  %s1648_s26 = smov (!%p488_p2), 112  }
   0xd   : > { %v556_v0 = vld [vmem:[%s1938_s3] sm:$0xff]  ;;  %v1640_v1 = vmov 0   ;;  %s1959_s25 = smov (!%p539_p3, %s1553_s25), 1  ;;  %vm562_vm0 = vcmask 64512   ;;  %v728_v30 = vlaneseq  ;;  %v1568_v51 = vld [vmem:[%s1943_s8 + $0x8] sm:$0xff] }
   0xe   : > { %1627 = vset.pattern.permute.xlu0 %v1640_v1  ;;  %1628 = vset.pattern.permute.xlu1 %v1640_v1  ;;  %s1608_s28 = sshll.u32 %s1959_s25, 4  ;;  %v555_v2 = vld [vmem:[%s1937_s2] sm:$0xff]  ;;  %s1609_s23 = sshll.u32 %s1959_s25, 5 }
   0xf   : > { %559 = vperm.xlu0 %1627, %v556_v0   ;;  %1629 = vset.pattern.permute.xlu2 %v1640_v1  ;;  %s543_s18 = scalar_lea.vmem %s1956_s30, %s1608_s28  ;;  %v669_v5 = vld [vmem:[%s1942_s7] sm:$0xff]  ;;  %s1641_s28 = smov 17   ;;  %v1796_v33 = vand.u32 127, %v728_v30 }
  0x10   : > { %v549_v3 = vld [vmem:[%s543_s18] sm:$0xff]  ;;  %v550_v4 = vld [vmem:[%s543_s18 + $0x8] sm:$0xff]  ;;  %s1644_s30 = smov 1   ;;  %s1645_s18 = smov 127  }
  0x11   : > { %581 = vmatpush.msra.mxu0 %v549_v3  ;;  %601 = vmatpush.msra.mxu1 %v550_v4  ;;  %v668_v13 = vld [vmem:[%s1941_s6] sm:$0xff]  ;;  %vm841_vm5 = vcmp.lt.s32.totalorder %v1796_v33, 15  ;;  %vm742_vm6 = vcmp.lt.s32.totalorder %v1796_v33, 16  ;;  %vm730_vm7 = vcmp.lt.s32.totalorder %v1796_v33, 17  ;;  %vm899_vm8 = vcmp.lt.s32.totalorder %v1796_v33, 1 }
  0x12   : > { %1562 = vmatmul.msk.f32.vlgmr.msra.gmra.mxu0 %vm562_vm0, %v555_v2  ;;  %1563 = vmatmul.msk.f32.vlgmr.msra.gmra.mxu1 %vm562_vm0, %v555_v2  ;;  %v612_v16 = vld [vmem:[%s1939_s4] sm:$0xff]  ;;  %vm1182_vm9 = vcmp.lt.s32.totalorder %v1796_v33, 111  ;;  %vm1066_vm10 = vcmp.lt.s32.totalorder %v1796_v33, 113  ;;  %vm1008_vm11 = vcmp.lt.s32.totalorder %v1796_v33, 127  ;;  %vm1124_vm12 = vcmp.lt.s32.totalorder %v1796_v33, 112 }
  0x13   : > { %637 = vmatpush.msra.mxu2 %v549_v3  ;;  %657 = vmatpush.msra.mxu3 %v550_v4  ;;  %v1236_v26 = vld [vmem:[%s1944_s9] sm:$0xff] }
  0x14   : > { %1564 = vmatmul.msk.f32.vlgmr.msra.gmra.mxu2 %vm562_vm0, %v612_v16  ;;  %1565 = vmatmul.msk.f32.vlgmr.msra.gmra.mxu3 %vm562_vm0, %v612_v16  ;;  %v613_v27 = vld [vmem:[%s1940_s5] sm:$0xff] }
  0x17   : > { %672 = vperm.xlu0 %1627, %v669_v5   ;;  %v733_v5 = vld [vmem:[%s1943_s8] sm:$0xff] }
  0x81   : > { %v560_v6 = vpop.permute.xlu0 %559 }
  0x89   : > { %v673_v17 = vpop.permute.xlu0 %672 }
  0x8f   : > { %v583_v7 = vpop.f32.mrf.mxu0  ;;  %v603_v8 = vpop.f32.mrf.mxu1 }
  0x90   : > { %v584_v9 = vadd.f32 %v583_v7, %v560_v6  ;;  %v604_v10 = vadd.f32 %v603_v8, %v560_v6  ;;  %v1573_v6 = vld [vmem:[%s1943_s8 + $0x10] sm:$0xff] }
  0x92   : > { %vm606_vm1 = vcmp.ge.f32.partialorder %v584_v9, 0.0  ;;  %v608_v11 = vmul.f32 0.1, %v584_v9  ;;  %vm607_vm2 = vcmp.ge.f32.partialorder %v604_v10, 0.0  ;;  %v609_v12 = vmul.f32 0.1, %v604_v10 }
  0x94   : > { %v1767_v14 = vsel %vm606_vm1, %v584_v9, %v608_v11  ;;  %v1769_v15 = vsel %vm607_vm2, %v604_v10, %v609_v12 }
  0x95   : > { %693 = vmatpush.msrb.mxu0 %v1767_v14  ;;  %713 = vmatpush.msrb.mxu1 %v1769_v15 }
  0x96   : > { %1566 = vmatmul.msk.f32.vlgmr.msrb.gmra.mxu0 %vm562_vm0, %v668_v13  ;;  %1567 = vmatmul.msk.f32.vlgmr.msrb.gmra.mxu1 %vm562_vm0, %v668_v13 }
  0x97   : > { %v659_v33 = vpop.f32.mrf.mxu3 }
 0x113   : > { %v695_v18 = vpop.f32.mrf.mxu0  ;;  %v715_v20 = vpop.f32.mrf.mxu1 }
 0x114   : > { %v696_v19 = vadd.f32 %v695_v18, %v673_v17  ;;  %v716_v23 = vadd.f32 %v715_v20, %v673_v17 }
 0x116   : > { %vm718_vm3 = vcmp.ge.f32.partialorder %v696_v19, 0.0  ;;  %v720_v21 = vmul.f32 0.01, %v696_v19  ;;  %v721_v24 = vmul.f32 0.01, %v716_v23  ;;  %vm719_vm4 = vcmp.ge.f32.partialorder %v716_v23, 0.0 }
 0x118   : > { %v1780_v22 = vsel %vm718_vm3, %v696_v19, %v720_v21  ;;  %v723_v25 = vsel %vm719_vm4, %v716_v23, %v721_v24  ;;  %v1576_v24 = vld [vmem:[%s1943_s8 + $0x18] sm:$0xff] }
 0x119   : > { %724 = vrot.lane.b32.xlu0 %v1780_v22, %s1641_s28  ;;  %837 = vrot.lane.b32.xlu2 %v1780_v22, %s1642_s29 }
 0x11a   : > { %738 = vrot.lane.b32.xlu1 %v1780_v22, %s1643_s0 }
 0x121   : > { %897 = vrot.lane.b32.xlu0 %v723_v25, %s1644_s30  ;;  %839 = vrot.lane.b32.xlu2 %v723_v25, %s1642_s29  ;;  %s1957_s29 = sld [smem:[#allocation3_spill]] }
 0x122   : > { %740 = vrot.lane.b32.xlu1 %v723_v25, %s1643_s0 }
 0x127   : > { %v1801_v35 = vld [vmem:[%s1957_s29] sm:$0xff]  ;;  %v1806_v36 = vld [vmem:[%s1957_s29 + $0x8] sm:$0xff]  ;;  %v1630_v12 = vld [vmem:[%s1957_s29 + $0x10] ss:$0 sm:$0xff] }
 0x128   : > { %v747_v37 = vperm.slane %v1801_v35, 1  ;;  %v748_v38 = vperm.slane %v1806_v36, 1  ;;  %v846_v40 = vperm.slane %v1801_v35, 2  ;;  %v847_v41 = vperm.slane %v1806_v36, 2  ;;  %v1631_v13 = vld [vmem:[%s1957_s29 + $0x18] ss:$0 sm:$0xff] }
 0x129   : > { %1004 = vrot.lane.b32.xlu0 %v1780_v22, %s1645_s18  ;;  %895 = vrot.lane.b32.xlu2 %v1780_v22, %s1644_s30  ;;  %v955_v43 = vperm.slane %v1801_v35, 4  ;;  %v956_v44 = vperm.slane %v1806_v36, 4  ;;  %v734_v57 = vperm.slane %v1801_v35, 0  ;;  %v735_v58 = vperm.slane %v1806_v36, 0 }
 0x12a   : > { %726 = vrot.lane.b32.xlu1 %v723_v25, %s1641_s28  ;;  %v904_v61 = vperm.slane %v1801_v35, 3  ;;  %v905_v62 = vperm.slane %v1806_v36, 3  ;;  %v1071_v9 = vperm.slane %v1801_v35, 6  ;;  %v1072_v10 = vperm.slane %v1806_v36, 6  ;;  %s548_s28 = scalar_lea.vmem %s1952_s17, %s1609_s23 }
 0x12b   : > { %v957_v55 = vmul.f32 %v955_v43, %v1780_v22  ;;  %v958_v56 = vmul.f32 %v956_v44, %v723_v25 }
 0x131   : > { %1180 = vrot.lane.b32.xlu0 %v723_v25, %s1646_s19  ;;  %1064 = vrot.lane.b32.xlu2 %v723_v25, %s1647_s1 }
 0x132   : > { %1062 = vrot.lane.b32.xlu1 %v1780_v22, %s1647_s1 }
 0x139   : > { %1239 = vperm.xlu0 %1627, %v1236_v26   ;;  %1178 = vrot.lane.b32.xlu2 %v1780_v22, %s1646_s19 }
 0x13a   : > { %1006 = vrot.lane.b32.xlu1 %v723_v25, %s1645_s18 }
 0x141   : > { %616 = vperm.xlu0 %1627, %v613_v27   ;;  %1122 = vrot.lane.b32.xlu2 %v723_v25, %s1648_s26  ;;  %v1579_v27 = vld [vmem:[%s1943_s8 + $0x20] sm:$0xff] }
 0x142   : > { %1120 = vrot.lane.b32.xlu1 %v1780_v22, %s1648_s26 }
 0x173   : > { %v838_v28 = vpop.permute.xlu2 %837 }
 0x17b   : > { %v840_v29 = vpop.permute.xlu2 %839 }
 0x17c   : > { %v842_v45 = vsel %vm841_vm5, %v838_v28, %v840_v29  ;;  %v843_v46 = vsel %vm841_vm5, %v840_v29, %v838_v28  ;;  %v1013_v28 = vperm.slane %v1801_v35, 5  ;;  %v1014_v29 = vperm.slane %v1806_v36, 5 }
 0x17d   : > { %v848_v52 = vmul.f32 %v846_v40, %v843_v46  ;;  %v849_v53 = vmul.f32 %v847_v41, %v842_v45  ;;  %v1129_v40 = vperm.slane %v1801_v35, 7  ;;  %v1130_v41 = vperm.slane %v1806_v36, 7 }
 0x183   : > { %v896_v34 = vpop.permute.xlu2 %895 }
 0x18b   : > { %v725_v31 = vpop.permute.xlu0 %724  ;;  %v1065_v54 = vpop.permute.xlu2 %1064 }
 0x18c   : > { %v739_v32 = vpop.permute.xlu1 %738 }
 0x193   : > { %v898_v39 = vpop.permute.xlu0 %897  ;;  %v1179_v11 = vpop.permute.xlu2 %1178 }
 0x194   : > { %v741_v42 = vpop.permute.xlu1 %740  ;;  %v900_v1 = vsel %vm899_vm8, %v896_v34, %v898_v39  ;;  %v901_v2 = vsel %vm899_vm8, %v898_v39, %v896_v34  ;;  %v1585_v39 = vld [vmem:[%s1943_s8 + $0x30] sm:$0xff] }
 0x195   : > { %v743_v47 = vsel %vm742_vm6, %v739_v32, %v741_v42  ;;  %v744_v48 = vsel %vm742_vm6, %v741_v42, %v739_v32  ;;  %v906_v7 = vmul.f32 %v904_v61, %v901_v2  ;;  %v907_v8 = vmul.f32 %v905_v62, %v900_v1  ;;  %v1467_v1 = vld [vmem:[%s1951_s16 + $0x8] sm:$0xff] }
 0x196   : > { %v749_v49 = vmul.f32 %v747_v37, %v744_v48  ;;  %v750_v50 = vmul.f32 %v748_v38, %v743_v47  ;;  %v1582_v38 = vld [vmem:[%s1943_s8 + $0x28] sm:$0xff]  ;;  %v1588_v48 = vld [vmem:[%s1943_s8 + $0x38] sm:$0xff] }
 0x198   : > { %769 = vmatpush.msrb.mxu2 %v749_v49  ;;  %789 = vmatpush.msrb.mxu3 %v750_v50 }
 0x199   : > { %1569 = vmatmul.msk.f32.vlgmr.msrb.gmra.mxu2 %vm562_vm0, %v1568_v51  ;;  %1570 = vmatmul.msk.f32.vlgmr.msrb.gmra.mxu3 %vm562_vm0, %v1568_v51  ;;  %v1300_v51 = vld [vmem:[%s1947_s12] sm:$0xff] }
 0x19a   : > { %868 = vmatpush.msra.mxu2 %v848_v52  ;;  %888 = vmatpush.msra.mxu3 %v849_v53 }
 0x19b   : > { %v1005_v59 = vpop.permute.xlu0 %1004  ;;  %v1123_v42 = vpop.permute.xlu2 %1122 }
 0x19c   : > { %977 = vmatpush.msrb.mxu2 %v957_v55  ;;  %997 = vmatpush.msrb.mxu3 %v958_v56  ;;  %v727_v60 = vpop.permute.xlu1 %726  ;;  %v1251_v56 = vld [vmem:[%s1946_s11] sm:$0xff] }
 0x19d   : > { %v731_v63 = vsel %vm730_vm7, %v725_v31, %v727_v60  ;;  %v732_v0 = vsel %vm730_vm7, %v727_v60, %v725_v31  ;;  %1254 = vperm.xlu1 %1628, %v1251_v56   ;;  %v1359_v56 = vld [vmem:[%s1949_s14 + $0x8] sm:$0xff] }
 0x19e   : > { %v736_v3 = vmul.f32 %v734_v57, %v732_v0  ;;  %v737_v4 = vmul.f32 %v735_v58, %v731_v63  ;;  %v1301_v57 = vld [vmem:[%s1948_s13] sm:$0xff] }
 0x19f   : > { %1304 = vperm.xlu2 %1629, %v1301_v57   ;;  %v1466_v0 = vld [vmem:[%s1951_s16] sm:$0xff] }
 0x1a0   : > { %812 = vmatpush.msra.mxu0 %v736_v3  ;;  %832 = vmatpush.msra.mxu1 %v737_v4 }
 0x1a1   : > { %1571 = vmatmul.msk.f32.vlgmr.msra.gmra.mxu0 %vm562_vm0, %v733_v5  ;;  %1572 = vmatmul.msk.f32.vlgmr.msra.gmra.mxu1 %vm562_vm0, %v733_v5 }
 0x1a2   : > { %1574 = vmatmul.msk.f32.vlgmr.msra.gmra.mxu2 %vm562_vm0, %v1573_v6  ;;  %1575 = vmatmul.msk.f32.vlgmr.msra.gmra.mxu3 %vm562_vm0, %v1573_v6 }
 0x1a3   : > { %926 = vmatpush.msrb.mxu0 %v906_v7  ;;  %946 = vmatpush.msrb.mxu1 %v907_v8  ;;  %v1181_v16 = vpop.permute.xlu0 %1180 }
 0x1a4   : > { %v1183_v17 = vsel %vm1182_vm9, %v1179_v11, %v1181_v16  ;;  %v1184_v18 = vsel %vm1182_vm9, %v1181_v16, %v1179_v11  ;;  %v1063_v19 = vpop.permute.xlu1 %1062 }
 0x1a5   : > { %v1067_v20 = vsel %vm1066_vm10, %v1063_v19, %v1065_v54  ;;  %v1068_v21 = vsel %vm1066_vm10, %v1065_v54, %v1063_v19  ;;  %v1189_v25 = vmul.f32 %v1630_v12, %v1183_v17  ;;  %v1190_v26 = vmul.f32 %v1631_v13, %v1184_v18  ;;  %1470 = vperm.xlu1 %1628, %v1466_v0  }
 0x1a6   : > { %v1073_v22 = vmul.f32 %v1071_v9, %v1067_v20  ;;  %v1074_v23 = vmul.f32 %v1072_v10, %v1068_v21 }
 0x1a7   : > { %1475 = vperm.xlu2 %1629, %v1467_v1  }
 0x1a8   : > { %1093 = vmatpush.msra.mxu2 %v1073_v22  ;;  %1113 = vmatpush.msra.mxu3 %v1074_v23 }
 0x1a9   : > { %1577 = vmatmul.msk.f32.vlgmr.msrb.gmra.mxu0 %vm562_vm0, %v1576_v24  ;;  %1578 = vmatmul.msk.f32.vlgmr.msrb.gmra.mxu1 %vm562_vm0, %v1576_v24 }
 0x1aa   : > { %1580 = vmatmul.msk.f32.vlgmr.msrb.gmra.mxu2 %vm562_vm0, %v1579_v27  ;;  %1581 = vmatmul.msk.f32.vlgmr.msrb.gmra.mxu3 %vm562_vm0, %v1579_v27 }
 0x1ab   : > { %1209 = vmatpush.msrb.mxu2 %v1189_v25  ;;  %1229 = vmatpush.msrb.mxu3 %v1190_v26  ;;  %v1240_v4 = vpop.permute.xlu0 %1239 }
 0x1ac   : > { %v1007_v30 = vpop.permute.xlu1 %1006 }
 0x1ad   : > { %v1009_v31 = vsel %vm1008_vm11, %v1005_v59, %v1007_v30  ;;  %v1010_v32 = vsel %vm1008_vm11, %v1007_v30, %v1005_v59 }
 0x1ae   : > { %v1015_v34 = vmul.f32 %v1013_v28, %v1009_v31  ;;  %v1016_v37 = vmul.f32 %v1014_v29, %v1010_v32 }
 0x1b0   : > { %1035 = vmatpush.msra.mxu0 %v1015_v34  ;;  %1055 = vmatpush.msra.mxu1 %v1016_v37  ;;  %v1250_v37 = vld [vmem:[%s1945_s10] sm:$0xff] }
 0x1b1   : > { %1583 = vmatmul.msk.f32.vlgmr.msra.gmra.mxu0 %vm562_vm0, %v1582_v38  ;;  %1584 = vmatmul.msk.f32.vlgmr.msra.gmra.mxu1 %vm562_vm0, %v1582_v38 }
 0x1b2   : > { %1586 = vmatmul.msk.f32.vlgmr.msra.gmra.mxu2 %vm562_vm0, %v1585_v39  ;;  %1587 = vmatmul.msk.f32.vlgmr.msra.gmra.mxu3 %vm562_vm0, %v1585_v39 }
 0x1b3   : > { %1325 = vmatpush.msra.mxu2 %v1767_v14  ;;  %1345 = vmatpush.msra.mxu3 %v1769_v15  ;;  %v1591_v14 = vld [vmem:[%s1943_s8 + $0x40] sm:$0xff]  ;;  %v639_v15 = vpop.f32.mrf.mxu2  ;;  %v617_v19 = vpop.permute.xlu0 %616 }
 0x1b4   : > { %v1121_v43 = vpop.permute.xlu1 %1120  ;;  %v640_v22 = vadd.f32 %v639_v15, %v617_v19  ;;  %v660_v23 = vadd.f32 %v659_v33, %v617_v19 }
 0x1b5   : > { %v1125_v44 = vsel %vm1124_vm12, %v1121_v43, %v1123_v42  ;;  %v1126_v45 = vsel %vm1124_vm12, %v1123_v42, %v1121_v43  ;;  %v1360_v42 = vld [vmem:[%s1950_s15] sm:$0xff]  ;;  %v1361_v43 = vld [vmem:[%s1950_s15 + $0x8] sm:$0xff] }
 0x1b6   : > { %v1131_v46 = vmul.f32 %v1129_v40, %v1125_v44  ;;  %v1132_v47 = vmul.f32 %v1130_v41, %v1126_v45  ;;  %v664_v30 = vmul.f32 0.1, %v640_v22  ;;  %v665_v31 = vmul.f32 0.1, %v660_v23 }
 0x1b7   : > { %vm662_vm15 = vcmp.ge.f32.partialorder %v640_v22, 0.0  ;;  %vm663_vm1 = vcmp.ge.f32.partialorder %v660_v23, 0.0 }
 0x1b8   : > { %1151 = vmatpush.msrb.mxu0 %v1131_v46  ;;  %1171 = vmatpush.msrb.mxu1 %v1132_v47  ;;  %v666_v40 = vsel %vm662_vm15, %v640_v22, %v664_v30  ;;  %v667_v41 = vsel %vm663_vm1, %v660_v23, %v665_v31 }
 0x1b9   : > { %1589 = vmatmul.msk.f32.vlgmr.msrb.gmra.mxu0 %vm562_vm0, %v1588_v48  ;;  %1590 = vmatmul.msk.f32.vlgmr.msrb.gmra.mxu1 %vm562_vm0, %v1588_v48 }
 0x1ba   : > { %1592 = vmatmul.msk.f32.vlgmr.msrb.gmra.mxu2 %vm562_vm0, %v1591_v14  ;;  %1593 = vmatmul.msk.f32.vlgmr.msrb.gmra.mxu3 %vm562_vm0, %v1591_v14 }
 0x1c2   : > { %1596 = vmatmul.msk.f32.vlgmr.msra.gmra.mxu2 %vm562_vm0, %v1300_v51  ;;  %1597 = vmatmul.msk.f32.vlgmr.msra.gmra.mxu3 %vm562_vm0, %v1300_v51 }
 0x1f9   : > { %v1305_v46 = vpop.permute.xlu2 %1304 }
 0x20f   : > { %v1255_v47 = vpop.permute.xlu1 %1254 }
 0x21c   : > { %v771_v35 = vpop.f32.mrf.mxu2  ;;  %v791_v36 = vpop.f32.mrf.mxu3 }
 0x21e   : > { %v814_v49 = vpop.f32.mrf.mxu0  ;;  %v834_v50 = vpop.f32.mrf.mxu1 }
 0x21f   : > { %v815_v58 = vadd.f32 %v814_v49, %v771_v35  ;;  %v835_v59 = vadd.f32 %v834_v50, %v791_v36 }
 0x225   : > { %v870_v52 = vpop.f32.mrf.mxu2  ;;  %v890_v53 = vpop.f32.mrf.mxu3 }
 0x226   : > { %v928_v54 = vpop.f32.mrf.mxu0  ;;  %v948_v55 = vpop.f32.mrf.mxu1  ;;  %v893_v60 = vadd.f32 %v870_v52, %v815_v58  ;;  %v894_v61 = vadd.f32 %v890_v53, %v835_v59  ;;  %v1358_v53 = vld [vmem:[%s1949_s14] sm:$0xff] }
 0x228   : > { %v951_v5 = vadd.f32 %v928_v54, %v893_v60  ;;  %v952_v6 = vadd.f32 %v948_v55, %v894_v61 }
 0x22d   : > { %v979_v62 = vpop.f32.mrf.mxu2  ;;  %v999_v63 = vpop.f32.mrf.mxu3 }
 0x22e   : > { %v1037_v2 = vpop.f32.mrf.mxu0  ;;  %v1057_v3 = vpop.f32.mrf.mxu1  ;;  %v1002_v7 = vadd.f32 %v979_v62, %v951_v5  ;;  %v1003_v8 = vadd.f32 %v999_v63, %v952_v6 }
 0x22f   : > { %v1471_v63 = vpop.permute.xlu1 %1470 }
 0x230   : > { %v1060_v11 = vadd.f32 %v1037_v2, %v1002_v7  ;;  %v1061_v12 = vadd.f32 %v1057_v3, %v1003_v8 }
 0x235   : > { %v1095_v9 = vpop.f32.mrf.mxu2  ;;  %v1115_v10 = vpop.f32.mrf.mxu3 }
 0x236   : > { %v1118_v13 = vadd.f32 %v1095_v9, %v1060_v11  ;;  %v1119_v16 = vadd.f32 %v1115_v10, %v1061_v12  ;;  %v1153_v17 = vpop.f32.mrf.mxu0  ;;  %v1173_v18 = vpop.f32.mrf.mxu1 }
 0x237   : > { %v1476_v12 = vpop.permute.xlu2 %1475 }
 0x238   : > { %v1176_v20 = vadd.f32 %v1153_v17, %v1118_v13  ;;  %v1177_v21 = vadd.f32 %v1173_v18, %v1119_v16 }
 0x23d   : > { %v1211_v24 = vpop.f32.mrf.mxu2  ;;  %v1231_v25 = vpop.f32.mrf.mxu3 }
 0x23e   : > { %v1234_v26 = vadd.f32 %v1211_v24, %v1176_v20  ;;  %v1235_v27 = vadd.f32 %v1231_v25, %v1177_v21 }
 0x240   : > { %v1242_v28 = vadd.f32 %v1240_v4, %v1234_v26  ;;  %v1243_v29 = vadd.f32 %v1240_v4, %v1235_v27 }
 0x242   : > { %v1246_v32 = vmul.f32 0.01, %v1242_v28  ;;  %v1247_v34 = vmul.f32 0.01, %v1243_v29  ;;  %vm1244_vm13 = vcmp.ge.f32.partialorder %v1242_v28, 0.0  ;;  %vm1245_vm14 = vcmp.ge.f32.partialorder %v1243_v29, 0.0 }
 0x244   : > { %v1248_v38 = vsel %vm1244_vm13, %v1242_v28, %v1246_v32  ;;  %v1249_v39 = vsel %vm1245_vm14, %v1243_v29, %v1247_v34 }
 0x245   : > { %1275 = vmatpush.msra.mxu0 %v1248_v38  ;;  %1295 = vmatpush.msra.mxu1 %v1249_v39  ;;  %v1347_v44 = vpop.f32.mrf.mxu3  ;;  %v1327_v45 = vpop.f32.mrf.mxu2 }
 0x246   : > { %1594 = vmatmul.msk.f32.vlgmr.msra.gmra.mxu0 %vm562_vm0, %v1250_v37  ;;  %1595 = vmatmul.msk.f32.vlgmr.msra.gmra.mxu1 %vm562_vm0, %v1250_v37  ;;  %v1348_v48 = vadd.f32 %v1347_v44, %v1305_v46  ;;  %v1328_v14 = vadd.f32 %v1327_v45, %v1305_v46 }
 0x247   : > { %1383 = vmatpush.msrb.mxu0 %v666_v40  ;;  %1406 = vmatpush.msrb.mxu1 %v667_v41 }
 0x24e   : > { %1598 = vmatmul.msk.f32.vlgmr.msrb.gmra.mxu0 %vm562_vm0, %v1360_v42  ;;  %1600 = vmatmul.msk.f32.vlgmr.msrb.gmra.mxu1 %vm562_vm0, %v1360_v42 }
 0x256   : > { %1599 = vmatmul.msk.f32.gmra.mxu0 %vm562_vm0, %v1361_v43  ;;  %1601 = vmatmul.msk.f32.gmra.mxu1 %vm562_vm0, %v1361_v43 }
 0x2c3   : > { %v1297_v15 = vpop.f32.mrf.mxu1  ;;  %v1277_v33 = vpop.f32.mrf.mxu0 }
 0x2c4   : > { %v1298_v35 = vadd.f32 %v1297_v15, %v1255_v47  ;;  %v1278_v36 = vadd.f32 %v1277_v33, %v1255_v47 }
 0x2c6   : > { %v1351_v49 = vadd.f32 %v1348_v48, %v1298_v35  ;;  %v1350_v50 = vadd.f32 %v1328_v14, %v1278_v36 }
 0x2c8   : > { %v1355_v51 = vmul.f32 0.01, %v1351_v49  ;;  %v1354_v52 = vmul.f32 0.01, %v1350_v50  ;;  %vm1352_vm2 = vcmp.ge.f32.partialorder %v1350_v50, 0.0  ;;  %vm1353_vm3 = vcmp.ge.f32.partialorder %v1351_v49, 0.0 }
 0x2ca   : > { %v1356_v54 = vsel %vm1352_vm2, %v1350_v50, %v1354_v52  ;;  %v1357_v55 = vsel %vm1353_vm3, %v1351_v49, %v1355_v51 }
 0x2cb   : > { %1435 = vmatpush.msrb.mxu2 %v1356_v54  ;;  %1458 = vmatpush.msrb.mxu3 %v1357_v55  ;;  %v1385_v57 = vpop.f32.mrf.mxu0  ;;  %v1408_v58 = vpop.f32.mrf.mxu1 }
 0x2cc   : > { %1602 = vmatmul.msk.f32.vlgmr.msrb.gmra.mxu2 %vm562_vm0, %v1358_v53  ;;  %1604 = vmatmul.msk.f32.vlgmr.msrb.gmra.mxu3 %vm562_vm0, %v1358_v53 }
 0x2d3   : > { %v1388_v4 = vpop.f32.mrf.mxu0  ;;  %v1411_v5 = vpop.f32.mrf.mxu1 }
 0x2d4   : > { %1603 = vmatmul.msk.f32.gmra.mxu2 %vm562_vm0, %v1359_v56  ;;  %1605 = vmatmul.msk.f32.gmra.mxu3 %vm562_vm0, %v1359_v56 }
 0x34f   : > { %v1437_v59 = vpop.f32.mrf.mxu2  ;;  %v1460_v60 = vpop.f32.mrf.mxu3 }
 0x350   : > { %v1438_v61 = vadd.f32 %v1437_v59, %v1385_v57  ;;  %v1461_v62 = vadd.f32 %v1460_v60, %v1408_v58 }
 0x352   : > { %v1478_v0 = vadd.f32 %v1471_v63, %v1438_v61  ;;  %v1479_v1 = vadd.f32 %v1471_v63, %v1461_v62 }
 0x354   : > { %vm1482_vm4 = vcmp.ge.f32.partialorder %v1478_v0, 0.0  ;;  %v1486_v2 = vmul.f32 0.1, %v1478_v0  ;;  %vm1483_vm5 = vcmp.ge.f32.partialorder %v1479_v1, 0.0  ;;  %v1487_v3 = vmul.f32 0.1, %v1479_v1 }
 0x356   : > { %v1490_v6 = vsel %vm1482_vm4, %v1478_v0, %v1486_v2  ;;  %v1491_v7 = vsel %vm1483_vm5, %v1479_v1, %v1487_v3 }
 0x357   : > { %1494 = vst [vmem:[%s548_s28] sm:$0xff] %v1490_v6  ;;  %v1440_v8 = vpop.f32.mrf.mxu2  ;;  %v1463_v9 = vpop.f32.mrf.mxu3 }
 0x358   : > { %1495 = vst [vmem:[%s548_s28 + $0x8] sm:$0xff] %v1491_v7  ;;  %v1441_v10 = vadd.f32 %v1440_v8, %v1388_v4  ;;  %v1464_v11 = vadd.f32 %v1463_v9, %v1411_v5 }
 0x35a   : > { %v1480_v13 = vadd.f32 %v1476_v12, %v1441_v10  ;;  %v1481_v16 = vadd.f32 %v1476_v12, %v1464_v11 }
 0x35c   : > { %vm1484_vm0 = vcmp.ge.f32.partialorder %v1480_v13, 0.0  ;;  %v1488_v17 = vmul.f32 0.1, %v1480_v13  ;;  %vm1485_vm6 = vcmp.ge.f32.partialorder %v1481_v16, 0.0  ;;  %v1489_v18 = vmul.f32 0.1, %v1481_v16 }
 0x35e   : > { %v1492_v19 = vsel %vm1484_vm0, %v1480_v13, %v1488_v17  ;;  %v1493_v20 = vsel %vm1485_vm6, %v1481_v16, %v1489_v18 }
 0x35f   : > { %1496 = vst [vmem:[%s548_s28 + $0x10] sm:$0xff] %v1492_v19 }
 0x360   : > { %1497 = vst [vmem:[%s548_s28 + $0x18] sm:$0xff] %v1493_v20 }
 0x361 PF: > { %s27_s24 = sadd.s32 1, %s1638_s24  }
 0x362   : > { %p24_p4 = scmp.ge.s32.totalorder %s27_s24, 4  }
 0x364   :  { %26 = sbr.rel (!%p24_p4) target bundleno = 3 (0x3), region = 126 }

</bundles_post_ra>
